<compile_context>
chip_gen: v7x
topology: tpu7x:2x2x1
jax: 0.10.0
libtpu: 0.0.40
codegen_flags: <defaults>
</compile_context>

<pallas_src>
import math
from functools import partial

import numpy as np
import jax
import jax.numpy as jnp
from jax.experimental import pallas as pl
from jax.experimental.pallas import tpu as pltpu

EPS = 1e-7
TR_MAX = 1024        # sublane rows per grid step (TR*128 anchors / step)

_PI_2 = math.pi / 2.0
_PI_4 = math.pi / 4.0
_T3P8 = 2.414213562373095    # tan(3*pi/8)
_TP8 = 0.4142135623730951    # tan(pi/8)


def _round_up(x, m):
    return ((x + m - 1) // m) * m


def _rcp(x):
    """Approximate EUP reciprocal + one Newton refinement (~1e-7 rel error)."""
    r = pl.reciprocal(x, approx=True)
    return r * (2.0 - x * r)


def _atan_abs_f32(x):
    """Cephes atanf of |x| (float32-accurate).

    The CIoU aspect penalty only uses arct**2 and atan is odd, so computing
    atan(|x|) lets us drop the sign compare/select/multiply (VALU trim).
    """
    ax = jnp.abs(x)
    big = ax > _T3P8
    mid = jnp.logical_and(jnp.logical_not(big), ax > _TP8)
    y = jnp.where(big, jnp.float32(_PI_2),
                  jnp.where(mid, jnp.float32(_PI_4), jnp.float32(0.0)))
    ax_big = jnp.where(big, ax, jnp.float32(1.0))          # guard rcp input
    xr = jnp.where(big, -_rcp(ax_big),
                   jnp.where(mid, (ax - 1.0) * _rcp(ax + 1.0), ax))
    z = xr * xr
    p = ((jnp.float32(8.05374449538e-2) * z - jnp.float32(1.38776856032e-1)) * z
         + jnp.float32(1.99777106478e-1)) * z - jnp.float32(3.33329491539e-1)
    return y + p * z * xr + xr


def _box_loss_kernel(slab_ref, ciou_ref, psum_ref):
    # slab_ref: (9, TR, 128) coordinate-major:
    #   planes 0..3 = pred x1,y1,x2,y2 ; 4..7 = targ x1,y1,x2,y2 ; 8 = box_norm*mask
    px1 = slab_ref[0]
    py1 = slab_ref[1]
    px2 = slab_ref[2]
    py2 = slab_ref[3]
    tx1 = slab_ref[4]
    ty1 = slab_ref[5]
    tx2 = slab_ref[6]
    ty2 = slab_ref[7]
    bnm = slab_ref[8]

    wp = px2 - px1
    hp = py2 - py1
    wt = tx2 - tx1
    ht = ty2 - ty1

    # ---- IoU ----
    iw = jnp.maximum(jnp.minimum(px2, tx2) - jnp.maximum(px1, tx1), 0.0)
    ih = jnp.maximum(jnp.minimum(py2, ty2) - jnp.maximum(py1, ty1), 0.0)
    inter = iw * ih
    union = wp * hp + wt * ht - inter
    iou = inter * _rcp(union + EPS)

    # ---- DIoU: center distance / enclosing-box diagonal ----
    dx = (px1 + px2) - (tx1 + tx2)
    dy = (py1 + py2) - (ty1 + ty2)
    cent_dis = 0.25 * (dx * dx + dy * dy)
    cw = jnp.maximum(px2, tx2) - jnp.minimum(px1, tx1)
    ch = jnp.maximum(py2, ty2) - jnp.minimum(py1, ty1)
    diag_dis = cw * cw + ch * ch + EPS
    diou = iou - cent_dis * _rcp(diag_dis)

    # ---- CIoU aspect-ratio penalty ----
    # atan(wp/hp') - atan(wt/ht') folded into one atan via the difference
    # identity; exact because widths/heights are non-negative (ratios >= 0,
    # so their product is > -1).  Only the square of arct is used.
    hp_e = hp + EPS
    ht_e = ht + EPS
    arct = _atan_abs_f32((wp * ht_e - wt * hp_e) * _rcp(hp_e * ht_e + wp * wt))
    v = jnp.float32(4.0 / (math.pi ** 2)) * arct * arct
    alpha = v * _rcp(v - iou + 1.0 + EPS)
    ciou = diou - alpha * v

    ciou_ref[...] = ciou                                   # dense per-anchor CIoU

    # Masked weighted partial sums for the loss.  bnm == box_norm * mask is zero
    # for invalid/padded anchors; the where() also blocks NaN/Inf from degenerate
    # invalid anchors (which PyTorch never sees because it gathers first).
    vals = jnp.where(bnm != 0.0, (1.0 - ciou) * bnm, 0.0)  # (TR, 128)
    tr = vals.shape[0]
    # Reduce (TR,128) -> (8,128) with pure cross-vreg VPU adds (no XLU reduce,
    # no 1/8-sublane store).  Final tiny reduction happens outside the kernel.
    psum_ref[...] = jnp.sum(vals.reshape(tr // 8, 8, 128), axis=0)[None]


@partial(jax.jit, static_argnames=("tr_max",))
def box_loss(predicts_bbox, targets_bbox, valid_masks, box_norm_dense, cls_norm,
             *, tr_max=TR_MAX):
    """Returns (loss_iou_scalar, dense per-anchor ciou[B*A])."""
    B, A, four = predicts_bbox.shape
    assert four == 4
    M = B * A

    R0 = _round_up(max((M + 127) // 128, 8), 8)
    TR = min(tr_max, R0)
    if R0 >= 16:
        # Guarantee >=2 grid steps so the parallel axis can shard across both
        # TensorCores on v7x (single-TC on v5e/v6e: harmless).
        TR = min(TR, _round_up(R0, 16) // 2)
    TR = max(8, _round_up(TR, 8))
    R = _round_up(R0, TR)
    Mp = R * 128
    ntiles = R // TR
    # VMEM budget @ TR=1024: input block 9*1024*128*4B = 4.5 MiB, ciou block
    # 0.5 MiB, double-buffered ~10 MiB  -> fits v5e 16 MiB default scoped VMEM
    # and v7x 64 MiB physical with headroom.

    # Single fused relayout to one coordinate-major (9, R, 128) slab (one
    # materialization under jit: cast + mask-fold + transpose + concat + pad).
    # TODO(synk): produce this layout upstream where the boxes are generated to
    # remove this HBM round trip entirely; also consider bf16 coordinate planes.
    pred = jnp.transpose(predicts_bbox.reshape(M, 4).astype(jnp.float32))   # (4, M)
    targ = jnp.transpose(targets_bbox.reshape(M, 4).astype(jnp.float32))    # (4, M)
    bnm = (box_norm_dense.astype(jnp.float32)
           * valid_masks.astype(jnp.float32)).reshape(1, M)                 # (1, M)
    slab = jnp.concatenate([pred, targ, bnm], axis=0)                       # (9, M)
    if Mp != M:
        slab = jnp.pad(slab, ((0, 0), (0, Mp - M)))
    slab = slab.reshape(9, R, 128)

    ciou2d, psum = pl.pallas_call(
        _box_loss_kernel,
        out_shape=(jax.ShapeDtypeStruct((R, 128), jnp.float32),
                   jax.ShapeDtypeStruct((ntiles, 8, 128), jnp.float32)),
        grid_spec=pltpu.PrefetchScalarGridSpec(
            num_scalar_prefetch=0,
            grid=(ntiles,),
            in_specs=[
                pl.BlockSpec((9, TR, 128), lambda i: (0, i, 0)),   # packed slab
            ],
            out_specs=(
                pl.BlockSpec((TR, 128), lambda i: (i, 0)),         # per-anchor ciou
                pl.BlockSpec((1, 8, 128), lambda i: (i, 0, 0)),    # per-tile partials
            ),
        ),
        compiler_params=pltpu.CompilerParams(
            dimension_semantics=(pltpu.PARALLEL,)),
    )(slab)

    # Tiny finalization in plain XLA (keeps the grid axis parallel).
    loss = jnp.sum(psum) / jnp.asarray(cls_norm, jnp.float32)
    ciou_flat = ciou2d.reshape(Mp)[:M]
    # TODO(synk): add a custom_vjp if this loss is used for training (forward only here).
    return loss, ciou_flat


def _ref_box_loss(predicts_bbox, targets_bbox, valid_masks, box_norm_dense, cls_norm):
    """Pure-JAX dense reference (same math as torch calculate_iou(..., 'ciou').diag())."""
    p = jnp.asarray(predicts_bbox, jnp.float32).reshape(-1, 4)
    t = jnp.asarray(targets_bbox, jnp.float32).reshape(-1, 4)
    m = jnp.asarray(valid_masks, jnp.float32).reshape(-1)
    bn = jnp.asarray(box_norm_dense, jnp.float32).reshape(-1)

    xi1 = jnp.maximum(p[:, 0], t[:, 0]); yi1 = jnp.maximum(p[:, 1], t[:, 1])
    xi2 = jnp.minimum(p[:, 2], t[:, 2]); yi2 = jnp.minimum(p[:, 3], t[:, 3])
    inter = jnp.clip(xi2 - xi1, 0) * jnp.clip(yi2 - yi1, 0)
    a1 = (p[:, 2] - p[:, 0]) * (p[:, 3] - p[:, 1])
    a2 = (t[:, 2] - t[:, 0]) * (t[:, 3] - t[:, 1])
    iou = inter / (a1 + a2 - inter + EPS)

    cx1 = (p[:, 2] + p[:, 0]) / 2; cy1 = (p[:, 3] + p[:, 1]) / 2
    cx2 = (t[:, 2] + t[:, 0]) / 2; cy2 = (t[:, 3] + t[:, 1]) / 2
    cent = (cx1 - cx2) ** 2 + (cy1 - cy2) ** 2
    cw = jnp.maximum(p[:, 2], t[:, 2]) - jnp.minimum(p[:, 0], t[:, 0])
    ch = jnp.maximum(p[:, 3], t[:, 3]) - jnp.minimum(p[:, 1], t[:, 1])
    diou = iou - cent / (cw ** 2 + ch ** 2 + EPS)

    arct = (jnp.arctan((p[:, 2] - p[:, 0]) / (p[:, 3] - p[:, 1] + EPS))
            - jnp.arctan((t[:, 2] - t[:, 0]) / (t[:, 3] - t[:, 1] + EPS)))
    v = (4.0 / math.pi ** 2) * arct ** 2
    alpha = v / (v - iou + 1.0 + EPS)
    ciou = diou - alpha * v

    loss = jnp.sum((1.0 - ciou) * bn * m) / jnp.asarray(cls_norm, jnp.float32)
    return loss, ciou


if __name__ == "__main__":
    key = jax.random.PRNGKey(0)
    B, A = 2, 1024
    k1, k2, k3, k4, k5, k6 = jax.random.split(key, 6)

    # Deterministic synthetic xyxy boxes with positive width/height.
    pxy = jax.random.uniform(k1, (B, A, 2), minval=0.0, maxval=10.0)
    pwh = jax.random.uniform(k2, (B, A, 2), minval=0.5, maxval=5.0)
    predicts_bbox = jnp.concatenate([pxy, pxy + pwh], axis=-1)       # [B, A, 4]
    txy = jax.random.uniform(k3, (B, A, 2), minval=0.0, maxval=10.0)
    twh = jax.random.uniform(k4, (B, A, 2), minval=0.5, maxval=5.0)
    targets_bbox = jnp.concatenate([txy, txy + twh], axis=-1)        # [B, A, 4]

    valid_masks = jax.random.bernoulli(k5, 0.6, (B, A))              # [B, A] bool
    # NOTE: PyTorch passes box_norm already gathered to the [N] valid anchors;
    # here it is supplied densely at [B, A] and the mask is folded in.
    box_norm_dense = jax.random.uniform(k6, (B, A), minval=0.1, maxval=2.0)
    cls_norm = jnp.float32(37.0)

    # Default path (here: 2 grid steps -> both TCs on v7x).
    loss, ciou_dense = box_loss(predicts_bbox, targets_bbox, valid_masks,
                                box_norm_dense, cls_norm)
    loss = jax.block_until_ready(loss)
    ciou_dense = jax.block_until_ready(ciou_dense)

    # Small-tile path to exercise a longer multi-step grid (8 tiles here).
    loss_mt, ciou_mt = box_loss(predicts_bbox, targets_bbox, valid_masks,
                                box_norm_dense, cls_norm, tr_max=8)
    loss_mt = jax.block_until_ready(loss_mt)
    ciou_mt = jax.block_until_ready(ciou_mt)

    # Dynamic-shape boolean gather (torch: predicts_bbox[valid_bbox].view(-1,4))
    # done with NumPy glue — same row-major ordering as torch bool indexing.
    mask_np = np.asarray(valid_masks).reshape(-1)
    iou_valid = np.asarray(ciou_dense)[mask_np]          # shape [N] like PyTorch `iou`

    # Correctness check against a pure-JAX dense reference.
    ref_loss, ref_ciou = _ref_box_loss(predicts_bbox, targets_bbox, valid_masks,
                                       box_norm_dense, cls_norm)
    assert np.allclose(np.asarray(loss), np.asarray(ref_loss), rtol=1e-4, atol=1e-4), \
        (float(loss), float(ref_loss))
    assert np.allclose(np.asarray(loss_mt), np.asarray(ref_loss), rtol=1e-4, atol=1e-4), \
        (float(loss_mt), float(ref_loss))
    assert np.allclose(np.asarray(ciou_dense), np.asarray(ref_ciou),
                       rtol=1e-4, atol=1e-4)
    assert np.allclose(np.asarray(ciou_mt), np.asarray(ref_ciou),
                       rtol=1e-4, atol=1e-4)
    assert iou_valid.shape[0] == int(mask_np.sum())

    print("KERNEL_OK")
</pallas_src>

<mosaic_0001>
module attributes {stable_mosaic.version = 11 : i64} {
  func.func @_box_loss_kernel(%arg0: i32, %arg1: memref<9x8x128xf32, #tpu.memory_space<vmem>>, %arg2: memref<8x128xf32, #tpu.memory_space<vmem>>, %arg3: memref<1x8x128xf32, #tpu.memory_space<vmem>>) attributes {dimension_semantics = [#tpu.dimension_semantics<parallel>], iteration_bounds = array<i64: 2>, scalar_prefetch = 0 : i64, scratch_operands = 0 : i64, tpu.core_type = #tpu.core_type<tc>, window_params = [{transform_indices = @transform_0, window_bounds = array<i64: 9, 8, 128>}, {transform_indices = @transform_1, window_bounds = array<i64: 8, 128>}, {transform_indices = @transform_2, window_bounds = array<i64: 1, 8, 128>}]} {
    %c0 = arith.constant 0 : index
    %c0_0 = arith.constant 0 : index
    %c0_1 = arith.constant 0 : index
    %0 = vector.load %arg1[%c0, %c0_0, %c0_1] : memref<9x8x128xf32, #tpu.memory_space<vmem>>, vector<1x8x128xf32>
    %1 = vector.shape_cast %0 : vector<1x8x128xf32> to vector<8x128xf32>
    %c1 = arith.constant 1 : index
    %c0_2 = arith.constant 0 : index
    %c0_3 = arith.constant 0 : index
    %2 = vector.load %arg1[%c1, %c0_2, %c0_3] : memref<9x8x128xf32, #tpu.memory_space<vmem>>, vector<1x8x128xf32>
    %3 = vector.shape_cast %2 : vector<1x8x128xf32> to vector<8x128xf32>
    %c2 = arith.constant 2 : index
    %c0_4 = arith.constant 0 : index
    %c0_5 = arith.constant 0 : index
    %4 = vector.load %arg1[%c2, %c0_4, %c0_5] : memref<9x8x128xf32, #tpu.memory_space<vmem>>, vector<1x8x128xf32>
    %5 = vector.shape_cast %4 : vector<1x8x128xf32> to vector<8x128xf32>
    %c3 = arith.constant 3 : index
    %c0_6 = arith.constant 0 : index
    %c0_7 = arith.constant 0 : index
    %6 = vector.load %arg1[%c3, %c0_6, %c0_7] : memref<9x8x128xf32, #tpu.memory_space<vmem>>, vector<1x8x128xf32>
    %7 = vector.shape_cast %6 : vector<1x8x128xf32> to vector<8x128xf32>
    %c4 = arith.constant 4 : index
    %c0_8 = arith.constant 0 : index
    %c0_9 = arith.constant 0 : index
    %8 = vector.load %arg1[%c4, %c0_8, %c0_9] : memref<9x8x128xf32, #tpu.memory_space<vmem>>, vector<1x8x128xf32>
    %9 = vector.shape_cast %8 : vector<1x8x128xf32> to vector<8x128xf32>
    %c5 = arith.constant 5 : index
    %c0_10 = arith.constant 0 : index
    %c0_11 = arith.constant 0 : index
    %10 = vector.load %arg1[%c5, %c0_10, %c0_11] : memref<9x8x128xf32, #tpu.memory_space<vmem>>, vector<1x8x128xf32>
    %11 = vector.shape_cast %10 : vector<1x8x128xf32> to vector<8x128xf32>
    %c6 = arith.constant 6 : index
    %c0_12 = arith.constant 0 : index
    %c0_13 = arith.constant 0 : index
    %12 = vector.load %arg1[%c6, %c0_12, %c0_13] : memref<9x8x128xf32, #tpu.memory_space<vmem>>, vector<1x8x128xf32>
    %13 = vector.shape_cast %12 : vector<1x8x128xf32> to vector<8x128xf32>
    %c7 = arith.constant 7 : index
    %c0_14 = arith.constant 0 : index
    %c0_15 = arith.constant 0 : index
    %14 = vector.load %arg1[%c7, %c0_14, %c0_15] : memref<9x8x128xf32, #tpu.memory_space<vmem>>, vector<1x8x128xf32>
    %15 = vector.shape_cast %14 : vector<1x8x128xf32> to vector<8x128xf32>
    %c8 = arith.constant 8 : index
    %c0_16 = arith.constant 0 : index
    %c0_17 = arith.constant 0 : index
    %16 = vector.load %arg1[%c8, %c0_16, %c0_17] : memref<9x8x128xf32, #tpu.memory_space<vmem>>, vector<1x8x128xf32>
    %17 = vector.shape_cast %16 : vector<1x8x128xf32> to vector<8x128xf32>
    %18 = arith.subf %5, %1 : vector<8x128xf32>
    %19 = arith.subf %7, %3 : vector<8x128xf32>
    %20 = arith.subf %13, %9 : vector<8x128xf32>
    %21 = arith.subf %15, %11 : vector<8x128xf32>
    %22 = arith.minimumf %5, %13 : vector<8x128xf32>
    %23 = arith.maximumf %1, %9 : vector<8x128xf32>
    %24 = arith.subf %22, %23 : vector<8x128xf32>
    %cst = arith.constant 0.000000e+00 : f32
    %25 = vector.broadcast %cst : f32 to vector<8x128xf32>
    %26 = arith.maximumf %24, %25 : vector<8x128xf32>
    %27 = arith.minimumf %7, %15 : vector<8x128xf32>
    %28 = arith.maximumf %3, %11 : vector<8x128xf32>
    %29 = arith.subf %27, %28 : vector<8x128xf32>
    %cst_18 = arith.constant 0.000000e+00 : f32
    %30 = vector.broadcast %cst_18 : f32 to vector<8x128xf32>
    %31 = arith.maximumf %29, %30 : vector<8x128xf32>
    %32 = arith.mulf %26, %31 : vector<8x128xf32>
    %33 = arith.mulf %18, %19 : vector<8x128xf32>
    %34 = arith.mulf %20, %21 : vector<8x128xf32>
    %35 = arith.addf %33, %34 : vector<8x128xf32>
    %36 = arith.subf %35, %32 : vector<8x128xf32>
    %cst_19 = arith.constant 1.000000e-07 : f32
    %37 = vector.broadcast %cst_19 : f32 to vector<8x128xf32>
    %38 = arith.addf %36, %37 : vector<8x128xf32>
    %39 = tpu.reciprocal %38 {approx = true} : vector<8x128xf32> -> vector<8x128xf32>
    %40 = arith.mulf %38, %39 : vector<8x128xf32>
    %cst_20 = arith.constant 2.000000e+00 : f32
    %41 = vector.broadcast %cst_20 : f32 to vector<8x128xf32>
    %42 = arith.subf %41, %40 : vector<8x128xf32>
    %43 = arith.mulf %39, %42 : vector<8x128xf32>
    %44 = arith.mulf %32, %43 : vector<8x128xf32>
    %45 = arith.addf %1, %5 : vector<8x128xf32>
    %46 = arith.addf %9, %13 : vector<8x128xf32>
    %47 = arith.subf %45, %46 : vector<8x128xf32>
    %48 = arith.addf %3, %7 : vector<8x128xf32>
    %49 = arith.addf %11, %15 : vector<8x128xf32>
    %50 = arith.subf %48, %49 : vector<8x128xf32>
    %51 = arith.mulf %47, %47 : vector<8x128xf32>
    %52 = arith.mulf %50, %50 : vector<8x128xf32>
    %53 = arith.addf %51, %52 : vector<8x128xf32>
    %cst_21 = arith.constant 2.500000e-01 : f32
    %54 = vector.broadcast %cst_21 : f32 to vector<8x128xf32>
    %55 = arith.mulf %54, %53 : vector<8x128xf32>
    %56 = arith.maximumf %5, %13 : vector<8x128xf32>
    %57 = arith.minimumf %1, %9 : vector<8x128xf32>
    %58 = arith.subf %56, %57 : vector<8x128xf32>
    %59 = arith.maximumf %7, %15 : vector<8x128xf32>
    %60 = arith.minimumf %3, %11 : vector<8x128xf32>
    %61 = arith.subf %59, %60 : vector<8x128xf32>
    %62 = arith.mulf %58, %58 : vector<8x128xf32>
    %63 = arith.mulf %61, %61 : vector<8x128xf32>
    %64 = arith.addf %62, %63 : vector<8x128xf32>
    %cst_22 = arith.constant 1.000000e-07 : f32
    %65 = vector.broadcast %cst_22 : f32 to vector<8x128xf32>
    %66 = arith.addf %64, %65 : vector<8x128xf32>
    %67 = tpu.reciprocal %66 {approx = true} : vector<8x128xf32> -> vector<8x128xf32>
    %68 = arith.mulf %66, %67 : vector<8x128xf32>
    %cst_23 = arith.constant 2.000000e+00 : f32
    %69 = vector.broadcast %cst_23 : f32 to vector<8x128xf32>
    %70 = arith.subf %69, %68 : vector<8x128xf32>
    %71 = arith.mulf %67, %70 : vector<8x128xf32>
    %72 = arith.mulf %55, %71 : vector<8x128xf32>
    %73 = arith.subf %44, %72 : vector<8x128xf32>
    %cst_24 = arith.constant 1.000000e-07 : f32
    %74 = vector.broadcast %cst_24 : f32 to vector<8x128xf32>
    %75 = arith.addf %19, %74 : vector<8x128xf32>
    %cst_25 = arith.constant 1.000000e-07 : f32
    %76 = vector.broadcast %cst_25 : f32 to vector<8x128xf32>
    %77 = arith.addf %21, %76 : vector<8x128xf32>
    %78 = arith.mulf %18, %77 : vector<8x128xf32>
    %79 = arith.mulf %20, %75 : vector<8x128xf32>
    %80 = arith.subf %78, %79 : vector<8x128xf32>
    %81 = arith.mulf %75, %77 : vector<8x128xf32>
    %82 = arith.mulf %18, %20 : vector<8x128xf32>
    %83 = arith.addf %81, %82 : vector<8x128xf32>
    %84 = tpu.reciprocal %83 {approx = true} : vector<8x128xf32> -> vector<8x128xf32>
    %85 = arith.mulf %83, %84 : vector<8x128xf32>
    %cst_26 = arith.constant 2.000000e+00 : f32
    %86 = vector.broadcast %cst_26 : f32 to vector<8x128xf32>
    %87 = arith.subf %86, %85 : vector<8x128xf32>
    %88 = arith.mulf %84, %87 : vector<8x128xf32>
    %89 = arith.mulf %80, %88 : vector<8x128xf32>
    %90 = math.absf %89 : vector<8x128xf32>
    %cst_27 = arith.constant 2.41421366 : f32
    %91 = vector.broadcast %cst_27 : f32 to vector<8x128xf32>
    %92 = arith.cmpf ogt, %90, %91 : vector<8x128xf32>
    %cst_28 = arith.constant dense<true> : vector<8x128xi1>
    %93 = arith.xori %92, %cst_28 : vector<8x128xi1>
    %cst_29 = arith.constant 0.414213568 : f32
    %94 = vector.broadcast %cst_29 : f32 to vector<8x128xf32>
    %95 = arith.cmpf ogt, %90, %94 : vector<8x128xf32>
    %96 = arith.andi %93, %95 : vector<8x128xi1>
    %cst_30 = arith.constant 0.785398185 : f32
    %cst_31 = arith.constant 0.000000e+00 : f32
    %97 = vector.broadcast %cst_30 : f32 to vector<8x128xf32>
    %98 = vector.broadcast %cst_31 : f32 to vector<8x128xf32>
    %99 = arith.select %96, %97, %98 : vector<8x128xi1>, vector<8x128xf32>
    %cst_32 = arith.constant 1.57079637 : f32
    %100 = vector.broadcast %cst_32 : f32 to vector<8x128xf32>
    %101 = arith.select %92, %100, %99 : vector<8x128xi1>, vector<8x128xf32>
    %cst_33 = arith.constant 1.000000e+00 : f32
    %102 = vector.broadcast %cst_33 : f32 to vector<8x128xf32>
    %103 = arith.select %92, %90, %102 : vector<8x128xi1>, vector<8x128xf32>
    %104 = tpu.reciprocal %103 {approx = true} : vector<8x128xf32> -> vector<8x128xf32>
    %105 = arith.mulf %103, %104 : vector<8x128xf32>
    %cst_34 = arith.constant 2.000000e+00 : f32
    %106 = vector.broadcast %cst_34 : f32 to vector<8x128xf32>
    %107 = arith.subf %106, %105 : vector<8x128xf32>
    %108 = arith.mulf %104, %107 : vector<8x128xf32>
    %cst_35 = arith.constant 0.000000e+00 : f32
    %109 = vector.broadcast %cst_35 : f32 to vector<8x128xf32>
    %110 = arith.subf %109, %108 : vector<8x128xf32>
    %cst_36 = arith.constant 1.000000e+00 : f32
    %111 = vector.broadcast %cst_36 : f32 to vector<8x128xf32>
    %112 = arith.subf %90, %111 : vector<8x128xf32>
    %cst_37 = arith.constant 1.000000e+00 : f32
    %113 = vector.broadcast %cst_37 : f32 to vector<8x128xf32>
    %114 = arith.addf %90, %113 : vector<8x128xf32>
    %115 = tpu.reciprocal %114 {approx = true} : vector<8x128xf32> -> vector<8x128xf32>
    %116 = arith.mulf %114, %115 : vector<8x128xf32>
    %cst_38 = arith.constant 2.000000e+00 : f32
    %117 = vector.broadcast %cst_38 : f32 to vector<8x128xf32>
    %118 = arith.subf %117, %116 : vector<8x128xf32>
    %119 = arith.mulf %115, %118 : vector<8x128xf32>
    %120 = arith.mulf %112, %119 : vector<8x128xf32>
    %121 = arith.select %96, %120, %90 : vector<8x128xi1>, vector<8x128xf32>
    %122 = arith.select %92, %110, %121 : vector<8x128xi1>, vector<8x128xf32>
    %123 = arith.mulf %122, %122 : vector<8x128xf32>
    %cst_39 = arith.constant 0.0805374458 : f32
    %124 = vector.broadcast %cst_39 : f32 to vector<8x128xf32>
    %125 = arith.mulf %124, %123 : vector<8x128xf32>
    %cst_40 = arith.constant 0.138776854 : f32
    %126 = vector.broadcast %cst_40 : f32 to vector<8x128xf32>
    %127 = arith.subf %125, %126 : vector<8x128xf32>
    %128 = arith.mulf %127, %123 : vector<8x128xf32>
    %cst_41 = arith.constant 0.199777111 : f32
    %129 = vector.broadcast %cst_41 : f32 to vector<8x128xf32>
    %130 = arith.addf %128, %129 : vector<8x128xf32>
    %131 = arith.mulf %130, %123 : vector<8x128xf32>
    %cst_42 = arith.constant 0.333329499 : f32
    %132 = vector.broadcast %cst_42 : f32 to vector<8x128xf32>
    %133 = arith.subf %131, %132 : vector<8x128xf32>
    %134 = arith.mulf %133, %123 : vector<8x128xf32>
    %135 = arith.mulf %134, %122 : vector<8x128xf32>
    %136 = arith.addf %101, %135 : vector<8x128xf32>
    %137 = arith.addf %136, %122 : vector<8x128xf32>
    %cst_43 = arith.constant 0.405284733 : f32
    %138 = vector.broadcast %cst_43 : f32 to vector<8x128xf32>
    %139 = arith.mulf %138, %137 : vector<8x128xf32>
    %140 = arith.mulf %139, %137 : vector<8x128xf32>
    %141 = arith.subf %140, %44 : vector<8x128xf32>
    %cst_44 = arith.constant 1.000000e+00 : f32
    %142 = vector.broadcast %cst_44 : f32 to vector<8x128xf32>
    %143 = arith.addf %141, %142 : vector<8x128xf32>
    %cst_45 = arith.constant 1.000000e-07 : f32
    %144 = vector.broadcast %cst_45 : f32 to vector<8x128xf32>
    %145 = arith.addf %143, %144 : vector<8x128xf32>
    %146 = tpu.reciprocal %145 {approx = true} : vector<8x128xf32> -> vector<8x128xf32>
    %147 = arith.mulf %145, %146 : vector<8x128xf32>
    %cst_46 = arith.constant 2.000000e+00 : f32
    %148 = vector.broadcast %cst_46 : f32 to vector<8x128xf32>
    %149 = arith.subf %148, %147 : vector<8x128xf32>
    %150 = arith.mulf %146, %149 : vector<8x128xf32>
    %151 = arith.mulf %140, %150 : vector<8x128xf32>
    %152 = arith.mulf %151, %140 : vector<8x128xf32>
    %153 = arith.subf %73, %152 : vector<8x128xf32>
    %c0_47 = arith.constant 0 : index
    %c0_48 = arith.constant 0 : index
    %154 = vector.load %arg2[%c0_47, %c0_48] : memref<8x128xf32, #tpu.memory_space<vmem>>, vector<8x128xf32>
    tpu.vector_store %arg2[%c0_47, %c0_48], %153 {strides = array<i32>} : memref<8x128xf32, #tpu.memory_space<vmem>>, vector<8x128xf32>,
    %cst_49 = arith.constant 0.000000e+00 : f32
    %155 = vector.broadcast %cst_49 : f32 to vector<8x128xf32>
    %156 = arith.cmpf one, %17, %155 : vector<8x128xf32>
    %cst_50 = arith.constant 1.000000e+00 : f32
    %157 = vector.broadcast %cst_50 : f32 to vector<8x128xf32>
    %158 = arith.subf %157, %153 : vector<8x128xf32>
    %159 = arith.mulf %158, %17 : vector<8x128xf32>
    %cst_51 = arith.constant 0.000000e+00 : f32
    %160 = vector.broadcast %cst_51 : f32 to vector<8x128xf32>
    %161 = arith.select %156, %159, %160 : vector<8x128xi1>, vector<8x128xf32>
    %162 = vector.shape_cast %161 : vector<8x128xf32> to vector<1x8x128xf32>
    %cst_52 = arith.constant dense<0.000000e+00> : vector<8x128xf32>
    %163 = vector.multi_reduction <add>, %162, %cst_52 [0] : vector<1x8x128xf32> to vector<8x128xf32>
    %164 = vector.shape_cast %163 : vector<8x128xf32> to vector<1x8x128xf32>
    %c0_53 = arith.constant 0 : index
    %c0_54 = arith.constant 0 : index
    %c0_55 = arith.constant 0 : index
    %165 = vector.load %arg3[%c0_53, %c0_54, %c0_55] : memref<1x8x128xf32, #tpu.memory_space<vmem>>, vector<1x8x128xf32>
    tpu.vector_store %arg3[%c0_53, %c0_54, %c0_55], %164 {strides = array<i32>} : memref<1x8x128xf32, #tpu.memory_space<vmem>>, vector<1x8x128xf32>,
    return
  }
  func.func @transform_0(%arg0: i32) -> (i32, i32, i32) {
    %c0_i32 = arith.constant 0 : i32
    %c0_i32_0 = arith.constant 0 : i32
    %c0_i32_1 = arith.constant 0 : i32
    return %c0_i32, %arg0, %c0_i32_0 : i32, i32, i32
  }
  func.func @transform_1(%arg0: i32) -> (i32, i32) {
    %c0_i32 = arith.constant 0 : i32
    %c0_i32_0 = arith.constant 0 : i32
    return %arg0, %c0_i32 : i32, i32
  }
  func.func @transform_2(%arg0: i32) -> (i32, i32, i32) {
    %c0_i32 = arith.constant 0 : i32
    %c0_i32_0 = arith.constant 0 : i32
    %c0_i32_1 = arith.constant 0 : i32
    return %arg0, %c0_i32, %c0_i32_0 : i32, i32, i32
  }
}

</mosaic_0001>

<bundles_post_ra>
// kernel: box_loss.1
= control target key start
LH: loop header
LB: loop body
LE: loop exit
PB: predicated region body
PF: predicated region fallthrough
CT: control target
= control target key end

     0   :  { %8 = vsyncpa [#allocation4], 0  ;;  %s758_s0 = inlined_call_operand.vmem [shape: f32[9,16,128], index: 0, kind: input, shape index: {}]   ;;  %s759_s1 = inlined_call_operand.hbm [shape: f32[16,128], index: 1, kind: output, shape index: {0}]   ;;  %s760_s2 = inlined_call_operand.vmem [shape: f32[2,8,128], index: 2, kind: output, shape index: {1}]  }
   0x1   :  { %10 = vsyncpa [#allocation4 + $0x1], 0  ;;  %s619_s9 = smov 0   ;;  %s621_s10 = smov 0  }
   0x2   :  { %s623_s11 = smov 0   ;;  %s625_s12 = smov 0  }
   0x3 LB: > { %s640_s13 = sadd.s32 4294967295, %s599_s12   ;;  %s460_s14 = sadd.s32 4294967294, %s599_s12   ;;  %s599_s12 = sphi %s625_s12, %s766_s12   ;;  %s595_s11 = sphi %s623_s11, %s765_s11   ;;  %s591_s10 = sphi %s621_s10, %s764_s10   ;;  %s587_s9 = sphi %s619_s9, %s763_s9  }
   0x4   : > { %s644_s15 = sadd.s32 1, %s599_s12   ;;  %s23_s16 = sadd.s32 1, %s595_s11 }
   0x5   : > { %s20_s17 = ssub.s32 %s599_s12, %s644_s15  ;;  %p30_p0 = scmp.ne.s32.totalorder %s595_s11, %s591_s10 }
   0x6   : > { %p21_p1 = scmp.eq.s32.totalorder %s20_s17, 0  ;;  %p31_p2 = scmp.eq.s32.totalorder %s599_s12, 0 }
   0x7   : > { %p60_p3 = scmp.eq.s32.totalorder %s640_s13, 1  ;;  %p65_p4 = scmp.ne.s32.totalorder %s591_s10, %s587_s9 }
   0x8   : > { %s656_s18 = scalar_select %p21_p1, %s595_s11, %s23_s16  }
   0x9   : > { %p32_p5 = por %p31_p2, %p30_p0  ;;  %p658_p6 = por %p60_p3, %p30_p0 }
   0xa   : > { %p66_p7 = scmp.eq.s32.totalorder %s460_s14, 1  ;;  %p462_p9 = scmp.ge.s32.totalorder %s599_s12, 2 }
   0xc   : > { %p662_p8 = por %p66_p7, %p65_p4  ;;  %108 = sbr.rel (%p462_p9) target bundleno = 28 (0x1c), region = 16 }
  0x13   : > { %111 = sbr.rel (!%p32_p5) target bundleno = 28 (0x1c), region = 20  ;;  %s113_s21 = sand.u32 (%p32_p5), 1, %s595_s11  }
  0x14   : > { %s463_s22 = sshll.u32 (%p32_p5), %s599_s12, 3  ;;  %s482_s23 = smul.u32 (%p32_p5), 72, %s113_s21 }
  0x15   : > { %s117_s26 = scalar_lea.vmem (%p32_p5), %s758_s0, %s463_s22 }
  0x16   : > { %v161_v0 = vld [vmem:[%s117_s26] sm:$0xff] (%p32_p5)  ;;  %v163_v1 = vld [vmem:[%s117_s26 + $0x10] sm:$0xff] (%p32_p5)  ;;  %s115_s27 = scalar_lea.vmem (%p32_p5), [#allocation2], %s482_s23 }
  0x17   : > { %v165_v2 = vld [vmem:[%s117_s26 + $0x20] sm:$0xff] (%p32_p5)  ;;  %v167_v3 = vld [vmem:[%s117_s26 + $0x30] sm:$0xff] (%p32_p5)  ;;  %162 = vst [vmem:[%s115_s27] sm:$0xff] (%p32_p5), %v161_v0  ;;  %164 = vst [vmem:[%s115_s27 + $0x8] sm:$0xff] (%p32_p5), %v163_v1 }
  0x18   : > { %v169_v4 = vld [vmem:[%s117_s26 + $0x40] sm:$0xff] (%p32_p5)  ;;  %v171_v5 = vld [vmem:[%s117_s26 + $0x50] sm:$0xff] (%p32_p5)  ;;  %166 = vst [vmem:[%s115_s27 + $0x10] sm:$0xff] (%p32_p5), %v165_v2  ;;  %168 = vst [vmem:[%s115_s27 + $0x18] sm:$0xff] (%p32_p5), %v167_v3 }
  0x19   : > { %170 = vst [vmem:[%s115_s27 + $0x20] sm:$0xff] (%p32_p5), %v169_v4  ;;  %172 = vst [vmem:[%s115_s27 + $0x28] sm:$0xff] (%p32_p5), %v171_v5  ;;  %v173_v6 = vld [vmem:[%s117_s26 + $0x60] sm:$0xff] (%p32_p5)  ;;  %v175_v7 = vld [vmem:[%s117_s26 + $0x70] sm:$0xff] (%p32_p5) }
  0x1a   : > { %v177_v8 = vld [vmem:[%s117_s26 + $0x80] sm:$0xff]  ;;  %174 = vst [vmem:[%s115_s27 + $0x30] sm:$0xff] %v173_v6  ;;  %176 = vst [vmem:[%s115_s27 + $0x38] sm:$0xff] %v175_v7 }
  0x1b   : > { %178 = vst [vmem:[%s115_s27 + $0x40] sm:$0xff] %v177_v8 }
  0x1c PF: > { %p464_p10 = scmp.ge.s32.totalorder %s599_s12, 1  ;;  %p183_p11 = scmp.lt.s32.totalorder %s599_s12, 3 }
  0x1e   : > { %p184_p12 = pnand %p464_p10, %p183_p11 }
  0x1f   : > { %s677_s28 = sand.u32 (!%p184_p12), 1, %s591_s10   ;;  %vm601_vm1 = vmmov (!%p184_p12), 1   ;;  %p215_p13 = scmp.lt.s32.totalorder (!%p184_p12), %s640_s13, 1 }
  0x20   : > { %187 = sbr.rel (%p184_p12) target bundleno = 168 (0xa8), region = 58  ;;  %s465_s3 = sshll.u32 (!%p184_p12), %s677_s28, 3 }
  0x21   : > { %s483_s29 = smul.u32 (!%p184_p12), 72, %s677_s28  ;;  %s208_s4 = scalar_lea.vmem (!%p184_p12), [#allocation3], %s465_s3 }
  0x22   : > { %s368_s5 = sshll.u32 (!%p184_p12), %s208_s4, 4  ;;  %s479_s6 = sshll.u32 (!%p184_p12), %s640_s13, 7  ;;  %s703_s5 = int_to_ptr.vmem [resolvable:$true] %s368_s5 }
  0x23   : > { %s680_s30 = scalar_lea.vmem (!%p184_p12), [#allocation2], %s483_s29  ;;  %s709_s14 = scalar_lea.hbm (!%p184_p12), %s759_s1, %s479_s6 }
  0x24   : > { %v219_v9 = vld [vmem:[%s680_s30] sm:$0xff] (!%p184_p12)  ;;  %v468_v10 = vld [vmem:[%s680_s30 + $0x10] sm:$0xff] (!%p184_p12)  ;;  %v467_v11 = vld [vmem:[%s680_s30 + $0x8] sm:$0xff] (!%p184_p12)  ;;  %s351_s17 = scalar_lea.sflag (!%p184_p12), [#allocation4], %s677_s28  ;;  %s537_s21 = scalar_lea.vmem (!%p184_p12), %s703_s5, 128 }
  0x25   : > { %v469_v12 = vld [vmem:[%s680_s30 + $0x18] sm:$0xff] (!%p184_p12)  ;;  %v470_v13 = vld [vmem:[%s680_s30 + $0x20] sm:$0xff] (!%p184_p12)  ;;  %v259_v14 = vadd.f32 (!%p184_p12), %v468_v10, %v219_v9  ;;  %v471_v15 = vld [vmem:[%s680_s30 + $0x28] sm:$0xff] (!%p184_p12)  ;;  %v236_v23 = vsub.f32 (!%p184_p12), %v468_v10, %v219_v9  ;;  %p538_p0 = scmp.ne.s32.totalorder (!%p184_p12), %s703_s5, %s537_s21  ;;  %s603_s22 = smov (!%p184_p12), [#allocation3]  }
  0x26   : > { %v472_v16 = vld [vmem:[%s680_s30 + $0x30] sm:$0xff] (!%p184_p12)  ;;  %v473_v17 = vld [vmem:[%s680_s30 + $0x38] sm:$0xff] (!%p184_p12)  ;;  %v262_v18 = vadd.f32 (!%p184_p12), %v469_v12, %v467_v11  ;;  %v237_v19 = vsub.f32 (!%p184_p12), %v469_v12, %v467_v11  ;;  %v270_v26 = vmin.f32 (!%p184_p12), %v219_v9, %v470_v13  ;;  %v273_v30 = vmin.f32 (!%p184_p12), %v467_v11, %v471_v15  ;;  %s541_s23 = sshll.u32 (!%p184_p12), %s603_s22, 4  ;;  %s542_s23 = int_to_ptr.vmem [resolvable:$false] %s541_s23 }
  0x27   : > { %v260_v20 = vadd.f32 %v472_v16, %v470_v13  ;;  %v263_v21 = vadd.f32 %v473_v17, %v471_v15  ;;  %v269_v22 = vmax.f32 %v468_v10, %v472_v16  ;;  %v238_v24 = vsub.f32 %v472_v16, %v470_v13  ;;  %s768_s13 = smov (!%p215_p13, %s640_s13), 1  ;;  %p539_p1 = pnand %p538_p0, %p658_p6 }
  0x28   : > { %v239_v25 = vsub.f32 %v473_v17, %v471_v15  ;;  %v272_v29 = vmax.f32 %v469_v12, %v473_v17  ;;  %v285_v35 = vadd.f32 1e-07, %v237_v19  ;;  %v240_v59 = vmin.f32 %v468_v10, %v472_v16  ;;  %s466_s16 = sshll.u32 %s768_s13, 3  ;;  %s543_s24 = scalar_lea.vmem %s542_s23, 256 }
  0x29   : > { %v261_v27 = vsub.f32 %v259_v14, %v260_v20  ;;  %v264_v28 = vsub.f32 %v262_v18, %v263_v21  ;;  %v271_v31 = vsub.f32 %v269_v22, %v270_v26  ;;  %v291_v38 = vmul.f32 %v238_v24, %v236_v23  ;;  %p540_p2 = pneg %p539_p1  ;;  %p544_p3 = scmp.lt.s32.totalorder %s703_s5, %s542_s23 }
  0x2a   : > { %v274_v34 = vsub.f32 %v272_v29, %v273_v30  ;;  %v286_v37 = vadd.f32 1e-07, %v239_v25  ;;  %v288_v47 = vmul.f32 %v285_v35, %v238_v24  ;;  %v241_v60 = vmax.f32 %v219_v9, %v470_v13  ;;  %p545_p4 = scmp.lt.s32.totalorder %s543_s24, %s537_s21 }
  0x2b   : > { %v265_v32 = vmul.f32 %v261_v27, %v261_v27  ;;  %v266_v33 = vmul.f32 %v264_v28, %v264_v28  ;;  %v275_v36 = vmul.f32 %v271_v31, %v271_v31  ;;  %v244_v61 = vmin.f32 %v469_v12, %v473_v17 }
  0x2c   : > { %v276_v40 = vmul.f32 %v274_v34, %v274_v34  ;;  %v290_v41 = vmul.f32 %v286_v37, %v285_v35  ;;  %v287_v46 = vmul.f32 %v286_v37, %v236_v23  ;;  %v245_v62 = vmax.f32 %v467_v11, %v471_v15  ;;  %p546_p5 = por %p545_p4, %p544_p3 }
  0x2d   : > { %v267_v39 = vadd.f32 %v266_v33, %v265_v32  ;;  %v242_v1 = vsub.f32 %v240_v59, %v241_v60  ;;  %v249_v6 = vmul.f32 %v237_v19, %v236_v23  ;;  %v250_v7 = vmul.f32 %v239_v25, %v238_v24 }
  0x2e   : > { %v277_v42 = vadd.f32 %v276_v40, %v275_v36  ;;  %v292_v43 = vadd.f32 %v291_v38, %v290_v41  ;;  %v289_v53 = vsub.f32 %v287_v46, %v288_v47  ;;  %v246_v2 = vsub.f32 %v244_v61, %v245_v62  ;;  %p547_p7 = pnand %p546_p5, %p540_p2 }
  0x2f   : > { %v268_v51 = vmul.f32 0.25, %v267_v39  ;;  %v243_v4 = vmax.f32 %v242_v1, 0.0  ;;  %v251_v14 = vadd.f32 %v250_v7, %v249_v6  ;;  %v602_v33 = vmov 0.0  }
  0x30   : > { %v278_v44 = vadd.f32 1e-07, %v277_v42  ;;  %v247_v5 = vmax.f32 %v246_v2, 0.0 }
  0x32   : > { %525 = vrcp.f32 %v278_v44  ;;  %v248_v8 = vmul.f32 %v247_v5, %v243_v4 }
  0x33   : > { %527 = vrcp.f32 %v292_v43 }
  0x34   : > { %v252_v9 = vsub.f32 %v251_v14, %v248_v8 }
  0x36   : > { %v253_v17 = vadd.f32 1e-07, %v252_v9 }
  0x3c   : > { %v526_v45 = vpop.eup %525 }
  0x3d   : > { %v528_v48 = vpop.eup %527  ;;  %v280_v49 = vmul.f32 %v526_v45, %v278_v44 }
  0x3e   : > { %v294_v50 = vmul.f32 %v528_v48, %v292_v43 }
  0x3f   : > { %v281_v52 = vsub.f32 2.0, %v280_v49 }
  0x40   : > { %v295_v54 = vsub.f32 2.0, %v294_v50 }
  0x41   : > { %v282_v55 = vmul.f32 %v526_v45, %v281_v52 }
  0x42   : > { %v296_v56 = vmul.f32 %v528_v48, %v295_v54 }
  0x43   : > { %v690_v57 = vmul.f32 %v282_v55, %v268_v51 }
  0x44   : > { %v297_v58 = vmul.f32 %v296_v56, %v289_v53 }
  0x46   : > { %v298_v63 = vand.u32 2147483647, %v297_v58  ;;  %v474_v58 = vld [vmem:[%s680_s30 + $0x40] sm:$0xff] }
  0x47   : > { %vm344_vm5 = vcmp.ne.f32.partialorder %v474_v58, 0.0 }
  0x48   : > { %vm299_vm0 = vcmp.gt.f32.partialorder %v298_v63, 2.4142137  ;;  %v312_v0 = vadd.f32 1.0, %v298_v63  ;;  %vm301_vm3 = vcmp.gt.f32.partialorder %v298_v63, 0.41421357  ;;  %v475_v15 = vadd.f32 -1.0, %v298_v63 }
  0x49   : > { %v305_v3 = vsel %vm299_vm0, %v298_v63, 1.0  ;;  %vm300_vm2 = vmxor %vm299_vm0, %vm601_vm1 }
  0x4a   : > { %529 = vrcp.f32 %v305_v3  ;;  %vm302_vm4 = vmand %vm300_vm2, %vm301_vm3 }
  0x4b   : > { %531 = vrcp.f32 %v312_v0  ;;  %v303_v34 = vsel %vm302_vm4, 0.7853982, %v602_v33 }
  0x4c   : > { %533 = vrcp.f32 %v253_v17  ;;  %v304_v38 = vsel %vm299_vm0, 1.5707964, %v303_v34 }
  0x54   : > { %v530_v18 = vpop.eup %529 }
  0x55   : > { %v532_v10 = vpop.eup %531  ;;  %v307_v12 = vmul.f32 %v530_v18, %v305_v3 }
  0x56   : > { %v314_v11 = vmul.f32 %v532_v10, %v312_v0  ;;  %v534_v29 = vpop.eup %533 }
  0x57   : > { %v308_v13 = vsub.f32 2.0, %v307_v12  ;;  %v255_v31 = vmul.f32 %v534_v29, %v253_v17 }
  0x58   : > { %v315_v16 = vsub.f32 2.0, %v314_v11 }
  0x59   : > { %v309_v20 = vmul.f32 %v530_v18, %v308_v13  ;;  %v256_v36 = vsub.f32 2.0, %v255_v31 }
  0x5a   : > { %v316_v21 = vmul.f32 %v532_v10, %v315_v16 }
  0x5b   : > { %v310_v19 = vsub.f32 0.0, %v309_v20  ;;  %v257_v40 = vmul.f32 %v534_v29, %v256_v36 }
  0x5c   : > { %v317_v22 = vmul.f32 %v475_v15, %v316_v21 }
  0x5d   : > { %v258_v43 = vmul.f32 %v257_v40, %v248_v8 }
  0x5e   : > { %v318_v23 = vsel %vm302_vm4, %v317_v22, %v298_v63 }
  0x5f   : > { %v319_v24 = vsel %vm299_vm0, %v310_v19, %v318_v23  ;;  %v284_v53 = vsub.f32 %v258_v43, %v690_v57 }
  0x60   : > { %v320_v25 = vmul.f32 %v319_v24, %v319_v24 }
  0x62   : > { %v321_v26 = vmul.f32 0.080537446, %v320_v25 }
  0x64   : > { %v476_v27 = vadd.f32 -0.13877685, %v321_v26 }
  0x66   : > { %v323_v28 = vmul.f32 %v476_v27, %v320_v25 }
  0x68   : > { %v324_v30 = vadd.f32 0.19977711, %v323_v28 }
  0x6a   : > { %v325_v32 = vmul.f32 %v324_v30, %v320_v25 }
  0x6c   : > { %v477_v35 = vadd.f32 -0.3333295, %v325_v32 }
  0x6e   : > { %v327_v37 = vmul.f32 %v477_v35, %v320_v25 }
  0x70   : > { %v328_v39 = vmul.f32 %v327_v37, %v319_v24 }
  0x72   : > { %v329_v41 = vadd.f32 %v328_v39, %v304_v38 }
  0x74   : > { %v330_v42 = vadd.f32 %v329_v41, %v319_v24 }
  0x76   : > { %v331_v44 = vmul.f32 0.40528473, %v330_v42 }
  0x78   : > { %v332_v45 = vmul.f32 %v331_v44, %v330_v42 }
  0x7a   : > { %v333_v46 = vsub.f32 %v332_v45, %v258_v43 }
  0x7c   : > { %v334_v47 = vadd.f32 1.0, %v333_v46 }
  0x7e   : > { %v335_v48 = vadd.f32 1e-07, %v334_v47 }
  0x80   : > { %535 = vrcp.f32 %v335_v48 }
  0x8a   : > { %v536_v49 = vpop.eup %535 }
  0x8b   : > { %v337_v50 = vmul.f32 %v536_v49, %v335_v48 }
  0x8d   : > { %v338_v51 = vsub.f32 2.0, %v337_v50 }
  0x8f   : > { %v339_v52 = vmul.f32 %v536_v49, %v338_v51 }
  0x91   : > { %v340_v54 = vmul.f32 %v339_v52, %v332_v45 }
  0x93   : > { %v341_v55 = vmul.f32 %v340_v54, %v332_v45 }
  0x95   : > { %v342_v56 = vsub.f32 %v284_v53, %v341_v55 }
  0x97   : > { %343 = vst [vmem:[%s208_s4] sm:$0xff] %v342_v56  ;;  %v345_v57 = vsub.f32 1.0, %v342_v56 }
  0x98   : > { %550 = shalt.err (!%p547_p7)
}
  0x99   : > { %s551_s25 = scalar_lea.hbm %s709_s14, 128  ;;  %s555_s28 = scalar_lea.hbm %s759_s1, 256 }
  0x9a   : > { %p552_p10 = scmp.ne.s32.totalorder %s709_s14, %s551_s25  ;;  %p556_p13 = scmp.lt.u32.totalorder %s709_s14, %s759_s1 }
  0x9b   : > { %p557_p0 = scmp.lt.u32.totalorder %s555_s28, %s551_s25  ;;  %p559_p2 = scmp.lt.u32.totalorder %s551_s25, %s709_s14 }
  0x9c   : > { %p553_p11 = pnand %p552_p10, %p658_p6 }
  0x9d   : > { %p558_p1 = por %p557_p0, %p556_p13 }
  0x9e   : > { %p554_p12 = pneg %p553_p11 }
  0x9f   : > { %p560_p3 = por %p559_p2, %p558_p1 }
  0xa1   : > { %p561_p4 = pnand %p560_p3, %p554_p12 }
  0xa3   : > { %564 = shalt.err (!%p561_p4)
}
  0xa4   : > { %484 = dma.vmem_to_hbm [thread:$0]  (%p658_p6), %s703_s5, 128, %s709_s14, %s351_s17   ;;  %v346_v59 = vmul.f32 %v474_v58, %v345_v57 }
  0xa5   : > { %s218_s6 = scalar_lea.vmem %s760_s2, %s466_s16 }
  0xa6   : > { %v347_v60 = vsel %vm344_vm5, %v346_v59, 0.0 }
  0xa7   : > { %349 = vst [vmem:[%s218_s6] sm:$0xff] %v347_v60 }
  0xa8 PF: > { %s383_s7 = sand.u32 1, %s587_s9   ;;  %p487_p5 = pnand %p462_p9, %p662_p8 }
  0xa9   : > { %s384_s19 = scalar_lea.sflag [#allocation4], %s383_s7 }
  0xaa   : > { %582 = dma.done.wait (!%p487_p5), %s384_s19, 128  }
  0xab   : > { %584 = vsyncadd (!%p487_p5), %s384_s19, 4294967168  ;;  %p13_p6 = scmp.ge.s32.totalorder %s644_s15, 4   ;;  %s763_s9 = smov %s591_s10 }
  0xac   : > { %s764_s10 = smov %s595_s11  ;;  %s765_s11 = smov %s656_s18 }
  0xad   : > { %s766_s12 = smov %s644_s15  ;;  %15 = sbr.rel (!%p13_p6) target bundleno = 3 (0x3), region = 122 }
  0xb4   :  { %396 = vsyncpa [#allocation4], 1 }
  0xb5   :  { %398 = vsyncpa [#allocation4 + $0x1], 1 }

</bundles_post_ra>
